<compile_context>
chip_gen: v5e
topology: v5e:2x2
jax: 0.10.0
libtpu: 0.0.40
codegen_flags: <defaults>
</compile_context>

<pallas_src>
import jax
import jax.numpy as jnp
from jax import lax
from jax.experimental import pallas as pl
from jax.experimental.pallas import tpu as pltpu

_LANE_CHUNK = 512  # in-kernel strip-mine width (multiple of 128)


def _netrelu_kernel(x_ref, w1_ref, b1_ref, w2_ref, b2_ref, o_ref):
    # x_ref : [1, NB]   batch on lanes
    # w1_ref: [H, 1]    hidden on sublanes
    # b1_ref: [H, 1]
    # w2_ref: [1, H]    fc2 weight row (MXU lhs)
    # b2_ref: [1]       scalar in SMEM
    # o_ref : [1, NB]
    nb = x_ref.shape[1]
    chunk = min(_LANE_CHUNK, nb)          # wrapper guarantees nb % chunk == 0
    n_chunks = nb // chunk

    # Hoist weight/bias loads out of the chunk loop (loaded once per grid step).
    w1 = w1_ref[...]                      # [H, 1]
    b1 = b1_ref[...]                      # [H, 1]
    w2 = w2_ref[...]                      # [1, H]
    b2 = b2_ref[0]                        # scalar (SMEM)

    def body(c, carry):
        start = pl.multiple_of(c * chunk, 128)
        x = x_ref[:, pl.ds(start, chunk)]                         # [1, chunk]
        # fc1 (K=1 contraction == outer product) + ReLU: pure VPU work.
        h = jnp.maximum(x * w1 + b1, 0.0)                         # [H, chunk]
        # fc2 (out-dim-1 contraction over H): offloaded to the idle MXU.
        y = jnp.dot(w2, h, preferred_element_type=jnp.float32)    # [1, chunk]
        o_ref[:, pl.ds(start, chunk)] = (y + b2).astype(o_ref.dtype)
        return carry

    if n_chunks == 1:
        body(0, 0)
    else:
        lax.fori_loop(0, n_chunks, body, 0, unroll=2)


def _jnp_reference(x, w1, b1, w2, b2):
    return jnp.maximum(x @ w1.T + b1, 0.0) @ w2.T + b2


def netrelu_forward(x, w1, b1, w2, b2, *, block_batch=None, use_pallas=None):
    """Forward pass of NetRelu.

    x : [N, 1] input (torch layout).
    w1: [H, 1], b1: [H]   (torch nn.Linear(1, H) weight/bias)
    w2: [1, H], b2: [1]   (torch nn.Linear(H, 1) weight/bias)
    Returns [N, 1].
    """
    n = x.shape[0]
    h = w1.shape[0]

    # Below a few thousand rows the fixed pallas_call overhead dominates; use
    # the plain expression unless the caller forces the kernel path.
    if use_pallas is None:
        use_pallas = n >= 4096
    if not use_pallas:
        return _jnp_reference(x, w1, b1, w2, b2)

    # Lane-dense batch block: multiple of 128, up to 32768 lanes per grid step
    # (amortizes the ~0.35 us per-step overhead); keep it a multiple of the
    # in-kernel chunk so strip-mining divides evenly.
    if block_batch is None:
        block_batch = min(32768, 128 * pl.cdiv(n, 128))
    if block_batch > _LANE_CHUNK:
        block_batch = _LANE_CHUNK * pl.cdiv(block_batch, _LANE_CHUNK)
    n_pad = block_batch * pl.cdiv(n, block_batch)

    # Re-layout in the wrapper: batch -> lanes (free bitcast), hidden -> sublanes.
    x_lanes = x.reshape(1, n)
    if n_pad != n:                         # pad only when actually needed
        x_lanes = jnp.pad(x_lanes, ((0, 0), (0, n_pad - n)))

    w1_k = w1.reshape(h, 1)
    b1_k = b1.reshape(h, 1)
    w2_k = w2.reshape(1, h)
    b2_k = b2.reshape(1)

    grid = (n_pad // block_batch,)

    cost = pl.CostEstimate(
        flops=5 * n_pad * h,                       # fc1 mul+add+relu, fc2 mac
        transcendentals=0,
        bytes_accessed=8 * n_pad + 4 * (3 * h + 1),
    )

    out2d = pl.pallas_call(
        _netrelu_kernel,
        out_shape=jax.ShapeDtypeStruct((1, n_pad), x.dtype),
        grid=grid,
        in_specs=[
            # x: one lane-dense batch block per grid step.
            pl.BlockSpec((1, block_batch), lambda i: (0, i)),
            # Weights/biases: constant index maps -> resident across all steps.
            pl.BlockSpec((h, 1), lambda i: (0, 0)),
            pl.BlockSpec((h, 1), lambda i: (0, 0)),
            pl.BlockSpec((1, h), lambda i: (0, 0)),
            # b2 scalar lives in SMEM (scalar path; no padded VMEM tile).
            pl.BlockSpec(memory_space=pltpu.SMEM),
        ],
        out_specs=pl.BlockSpec((1, block_batch), lambda i: (0, i)),
        compiler_params=pltpu.CompilerParams(
            dimension_semantics=("parallel",),
            # Working set per step is small (strip-mined), but set an explicit
            # limit so v5e's 16 MiB scoped default is never the constraint.
            vmem_limit_bytes=32 * 1024 * 1024,
        ),
        cost_estimate=cost,
    )(x_lanes, w1_k, b1_k, w2_k, b2_k)

    if n_pad == n:
        return out2d.reshape(n, 1)          # free bitcast, no slice copy
    return out2d[0, :n].reshape(n, 1)


def init_params(key, n_hidden):
    """Deterministic init mirroring torch nn.Linear shapes exactly."""
    k1, k2, k3, k4 = jax.random.split(key, 4)
    # torch Linear(1, H): weight [H, 1], bias [H], bound = 1/sqrt(1)
    bound1 = 1.0
    w1 = jax.random.uniform(k1, (n_hidden, 1), jnp.float32, -bound1, bound1)
    b1 = jax.random.uniform(k2, (n_hidden,), jnp.float32, -bound1, bound1)
    # torch Linear(H, 1): weight [1, H], bias [1], bound = 1/sqrt(H)
    bound2 = 1.0 / (n_hidden ** 0.5)
    w2 = jax.random.uniform(k3, (1, n_hidden), jnp.float32, -bound2, bound2)
    b2 = jax.random.uniform(k4, (1,), jnp.float32, -bound2, bound2)
    return w1, b1, w2, b2


if __name__ == "__main__":
    n_hidden_neurons = 32

    key = jax.random.PRNGKey(0)
    kx, kp, kx2 = jax.random.split(key, 3)
    w1, b1, w2, b2 = init_params(kp, n_hidden_neurons)

    # Small demo batch — force the Pallas path so the kernel is exercised.
    batch = 8
    x = jax.random.normal(kx, (batch, 1), dtype=jnp.float32)
    out = netrelu_forward(x, w1, b1, w2, b2, use_pallas=True)
    jax.block_until_ready(out)
    ref = _jnp_reference(x, w1, b1, w2, b2)
    assert out.shape == (batch, 1)
    assert jnp.allclose(out, ref, atol=1e-5, rtol=1e-5), "mismatch vs reference"

    # Second check: non-aligned batch exercises padding + multi-chunk loop.
    batch2 = 1500
    x2 = jax.random.normal(kx2, (batch2, 1), dtype=jnp.float32)
    out2 = netrelu_forward(x2, w1, b1, w2, b2, use_pallas=True)
    jax.block_until_ready(out2)
    ref2 = _jnp_reference(x2, w1, b1, w2, b2)
    assert out2.shape == (batch2, 1)
    assert jnp.allclose(out2, ref2, atol=1e-5, rtol=1e-5), "mismatch vs reference"

    print("KERNEL_OK")
</pallas_src>

<mosaic_0001>
module attributes {stable_mosaic.version = 11 : i64} {
  func.func @_netrelu_kernel(%arg0: i32, %arg1: memref<1x128xf32, #tpu.memory_space<vmem>>, %arg2: memref<32x1xf32, #tpu.memory_space<vmem>>, %arg3: memref<32x1xf32, #tpu.memory_space<vmem>>, %arg4: memref<1x32xf32, #tpu.memory_space<vmem>>, %arg5: memref<1xf32, #tpu.memory_space<smem>>, %arg6: memref<1x128xf32, #tpu.memory_space<vmem>>) attributes {dimension_semantics = [#tpu.dimension_semantics<parallel>], iteration_bounds = array<i64: 1>, scalar_prefetch = 0 : i64, scratch_operands = 0 : i64, tpu.core_type = #tpu.core_type<tc>, window_params = [{transform_indices = @transform_0, window_bounds = array<i64: 1, 128>}, {pipeline_mode = #tpu.pipeline_mode<synchronous>, transform_indices = @transform_1, window_bounds = array<i64: 32, 1>}, {pipeline_mode = #tpu.pipeline_mode<synchronous>, transform_indices = @transform_2, window_bounds = array<i64: 32, 1>}, {pipeline_mode = #tpu.pipeline_mode<synchronous>, transform_indices = @transform_3, window_bounds = array<i64: 1, 32>}, {transform_indices = @transform_4, window_bounds = array<i64: 1>}, {transform_indices = @transform_5, window_bounds = array<i64: 1, 128>}]} {
    %c0 = arith.constant 0 : index
    %c0_0 = arith.constant 0 : index
    %0 = vector.load %arg2[%c0, %c0_0] : memref<32x1xf32, #tpu.memory_space<vmem>>, vector<32x1xf32>
    %c0_1 = arith.constant 0 : index
    %c0_2 = arith.constant 0 : index
    %1 = vector.load %arg3[%c0_1, %c0_2] : memref<32x1xf32, #tpu.memory_space<vmem>>, vector<32x1xf32>
    %c0_3 = arith.constant 0 : index
    %c0_4 = arith.constant 0 : index
    %2 = vector.load %arg4[%c0_3, %c0_4] : memref<1x32xf32, #tpu.memory_space<vmem>>, vector<1x32xf32>
    %c0_5 = arith.constant 0 : index
    %3 = memref.load %arg5[%c0_5] : memref<1xf32, #tpu.memory_space<smem>>
    %c0_i32 = arith.constant 0 : i32
    %4 = tpu.assume_multiple %c0_i32, 128 : i32
    %c0_6 = arith.constant 0 : index
    %5 = arith.index_cast %4 : i32 to index
    %6 = vector.load %arg1[%c0_6, %5] : memref<1x128xf32, #tpu.memory_space<vmem>>, vector<1x128xf32>
    %7 = vector.broadcast %6 : vector<1x128xf32> to vector<32x128xf32>
    %8 = vector.broadcast %0 : vector<32x1xf32> to vector<32x128xf32>
    %9 = arith.mulf %7, %8 : vector<32x128xf32>
    %10 = vector.broadcast %1 : vector<32x1xf32> to vector<32x128xf32>
    %11 = arith.addf %9, %10 : vector<32x128xf32>
    %cst = arith.constant 0.000000e+00 : f32
    %12 = vector.broadcast %cst : f32 to vector<32x128xf32>
    %13 = arith.maximumf %11, %12 : vector<32x128xf32>
    %cst_7 = arith.constant dense<0.000000e+00> : vector<1x128xf32>
    %14 = tpu.matmul %2, %13, %cst_7 {dimension_numbers = #tpu.dot_dimension_numbers<[1], [0], [0], [1], [0, 0, 1, 1], [], []>} : vector<1x32xf32>, vector<32x128xf32>, vector<1x128xf32> -> vector<1x128xf32>
    %15 = vector.broadcast %3 : f32 to vector<1x128xf32>
    %16 = arith.addf %14, %15 : vector<1x128xf32>
    %c0_8 = arith.constant 0 : index
    %17 = arith.index_cast %4 : i32 to index
    %18 = vector.load %arg6[%c0_8, %17] : memref<1x128xf32, #tpu.memory_space<vmem>>, vector<1x128xf32>
    tpu.vector_store %arg6[%c0_8, %17], %16 {strides = array<i32>} : memref<1x128xf32, #tpu.memory_space<vmem>>, vector<1x128xf32>,
    return
  }
  func.func @transform_0(%arg0: i32) -> (i32, i32) {
    %c0_i32 = arith.constant 0 : i32
    %c0_i32_0 = arith.constant 0 : i32
    return %c0_i32, %arg0 : i32, i32
  }
  func.func @transform_1(%arg0: i32) -> (i32, i32) {
    %c0_i32 = arith.constant 0 : i32
    %c0_i32_0 = arith.constant 0 : i32
    %c0_i32_1 = arith.constant 0 : i32
    return %c0_i32, %c0_i32_0 : i32, i32
  }
  func.func @transform_2(%arg0: i32) -> (i32, i32) {
    %c0_i32 = arith.constant 0 : i32
    %c0_i32_0 = arith.constant 0 : i32
    %c0_i32_1 = arith.constant 0 : i32
    return %c0_i32, %c0_i32_0 : i32, i32
  }
  func.func @transform_3(%arg0: i32) -> (i32, i32) {
    %c0_i32 = arith.constant 0 : i32
    %c0_i32_0 = arith.constant 0 : i32
    %c0_i32_1 = arith.constant 0 : i32
    return %c0_i32, %c0_i32_0 : i32, i32
  }
  func.func @transform_4(%arg0: i32) -> i32 {
    %c0_i32 = arith.constant 0 : i32
    %c0_i32_0 = arith.constant 0 : i32
    return %c0_i32 : i32
  }
  func.func @transform_5(%arg0: i32) -> (i32, i32) {
    %c0_i32 = arith.constant 0 : i32
    %c0_i32_0 = arith.constant 0 : i32
    return %c0_i32, %arg0 : i32, i32
  }
}

</mosaic_0001>

<bundles_post_ra>
// kernel: tpu_custom_call.1
= control target key start
LH: loop header
LB: loop body
LE: loop exit
PB: predicated region body
PF: predicated region fallthrough
CT: control target
= control target key end

     0   :  { %v163_v2 = vmov 0   ;;  %s231_s0 = inlined_call_operand.vmem [shape: f32[1,128], index: 0, kind: input, shape index: {}]   ;;  %s232_s1 = inlined_call_operand.vmem [shape: f32[32,1], index: 1, kind: input, shape index: {}]   ;;  %s233_s2 = inlined_call_operand.vmem [shape: f32[32,1], index: 2, kind: input, shape index: {}]   ;;  %s234_s3 = inlined_call_operand.vmem [shape: f32[1,32], index: 3, kind: input, shape index: {}]   ;;  %s235_s4 = inlined_call_operand.<no memory space> [shape: f32[1], index: 4, kind: input, shape index: {}]   ;;  %s236_s5 = inlined_call_operand.hbm [shape: f32[1,128], index: 5, kind: output, shape index: {}]  }
   0x1   :  { %v29_v0 = vld [vmem:[%s233_s2 + $0x18] sm:$0xff]  ;;  %134 = vset.pattern.permute.xlu1 %v163_v2  ;;  %133 = vset.pattern.permute.xlu0 %v163_v2  ;;  %v28_v3 = vld [vmem:[%s233_s2 + $0x10] sm:$0xff] }
   0x2   :  { %v25_v1 = vld [vmem:[%s232_s1 + $0x18] sm:$0xff]  ;;  %77 = vperm.xlu1 %134, %v29_v0   ;;  %135 = vset.pattern.permute.xlu2 %v163_v2 }
   0x3   :  { %53 = vperm.xlu0 %133, %v25_v1  }
   0x4   :  { %11 = vsyncpa [#allocation4], 0  ;;  %72 = vperm.xlu2 %135, %v28_v3   ;;  %v24_v4 = vld [vmem:[%s232_s1 + $0x10] sm:$0xff]  ;;  %v23_v5 = vld [vmem:[%s232_s1 + $0x8] sm:$0xff]  ;;  %vm89_vm0 = vcmask 261120   ;;  %v88_v31 = vstv %s235_s4  ;;  %s164_s12 = smov [#allocation3]  }
   0x5   :  { %v22_v6 = vld [vmem:[%s232_s1] sm:$0xff]  ;;  %v27_v7 = vld [vmem:[%s233_s2 + $0x8] sm:$0xff]  ;;  %s119_s13 = sshll.u32 %s164_s12, 4  ;;  %s121_s16 = sshll.u32 %s236_s5, 4  ;;  %s120_s13 = int_to_ptr.vmem [resolvable:$true] %s119_s13  ;;  %s122_s16 = int_to_ptr.hbm [resolvable:$true] %s121_s16 }
   0x6   :  { %v26_v8 = vld [vmem:[%s233_s2] sm:$0xff] }
   0x7   :  { %v136_v9 = vld [vmem:[%s231_s0] ss:$0 sm:$0xff] }
   0x8   :  { %v30_v30 = vld [vmem:[%s234_s3] sm:$0x1] }
   0xa   :  { %43 = vperm.xlu1 %134, %v23_v5  }
   0xb   :  { %48 = vperm.xlu0 %133, %v24_v4  }
   0xc   :  { %38 = vperm.xlu2 %135, %v22_v6  }
  0x12   :  { %62 = vperm.xlu1 %134, %v26_v8  }
  0x13   :  { %67 = vperm.xlu0 %133, %v27_v7  }
  0x5e   :  { %v73_v13 = vpop.permute.xlu2 %72 }
  0x66   :  { %v39_v20 = vpop.permute.xlu2 %38 }
  0x67   :  { %v56_v23 = vmul.f32 %v136_v9, %v39_v20 }
  0x74   :  { %v78_v10 = vpop.permute.xlu1 %77 }
  0x75   :  { %v54_v11 = vpop.permute.xlu0 %53 }
  0x76   :  { %v59_v12 = vmul.f32 %v136_v9, %v54_v11 }
  0x78   :  { %v83_v14 = vadd.f32 %v78_v10, %v59_v12 }
  0x7a   :  { %v87_v15 = vmax.f32 %v83_v14, 0.0 }
  0x7c   :  { %105 = vmatpush.msra.mxu0 %v87_v15  ;;  %v44_v17 = vpop.permute.xlu1 %43 }
  0x7d   :  { %v49_v16 = vpop.permute.xlu0 %48  ;;  %v57_v22 = vmul.f32 %v136_v9, %v44_v17 }
  0x7e   :  { %v58_v18 = vmul.f32 %v136_v9, %v49_v16 }
  0x80   :  { %v82_v19 = vadd.f32 %v73_v13, %v58_v18 }
  0x82   :  { %v86_v21 = vmax.f32 %v82_v19, 0.0 }
  0x84   :  { %106 = vmatpush.msra.mxu0 %v86_v21  ;;  %v63_v25 = vpop.permute.xlu1 %62 }
  0x85   :  { %v68_v24 = vpop.permute.xlu0 %67  ;;  %v80_v27 = vadd.f32 %v63_v25, %v56_v23 }
  0x86   :  { %v81_v26 = vadd.f32 %v68_v24, %v57_v22 }
  0x87   :  { %v84_v29 = vmax.f32 %v80_v27, 0.0 }
  0x88   :  { %v85_v28 = vmax.f32 %v81_v26, 0.0 }
  0x8a   :  { %107 = vmatpush.msra.mxu0 %v85_v28 }
  0x8c   :  { %108 = vmatpush.msra.mxu0 %v84_v29 }
  0x8d   :  { %130 = vmatmul.msk.f32.vlgmr.msra.gmra.mxu0 %vm89_vm0, %v30_v30 }
 0x10a   :  { %v110_v32 = vpop.f32.mrf.mxu0 }
 0x10b   :  { %v111_v33 = vadd.f32 %v110_v32, %v88_v31 }
 0x10d   :  { %113 = vst [vmem:[#allocation3] sm:$0x1] %v111_v33 }
 0x10e   :  { %124 = dma.vmem_to_hbm [thread:$0]  %s120_s13, 16, %s122_s16, [#allocation4]  }
 0x10f   :  { %161 = dma.done.wait [#allocation4], 16  }
 0x110   :  { %162 = vsyncadd [#allocation4], 4294967280 }
 0x111   :  { %129 = vsyncpa [#allocation4], 1 }

</bundles_post_ra>
